<compile_context>
chip_gen: v7x
topology: tpu7x:2x2x1
jax: 0.10.0
libtpu: 0.0.40
codegen_flags: <defaults>
</compile_context>

<pallas_src>
import jax
import jax.numpy as jnp
from jax import lax
from jax.experimental import pallas as pl
from jax.experimental.pallas import tpu as pltpu


def linear_kernel(x_ref, w_ref, b_ref, o_ref):
    # x_ref: (TB, in_f); w_ref: (out_f, in_f)  [PyTorch nn.Linear layout]
    # y = x @ W.T + b  -> contract x axis 1 against W axis 1, no transpose needed.
    acc = lax.dot_general(
        x_ref[...],
        w_ref[...],
        dimension_numbers=(((1,), (1,)), ((), ())),
        preferred_element_type=jnp.float32,
    )
    o_ref[...] = (acc + b_ref[...]).astype(o_ref.dtype)


def smallnet_forward(x, weight, bias, *, max_tile_rows=4096, min_grid_steps=2,
                     vmem_limit_bytes=32 << 20):
    """y = x @ weight.T + bias  (PyTorch nn.Linear semantics).

    x:      [B, in_features]             float32
    weight: [out_features, in_features]  float32 (PyTorch layout, NOT transposed)
    bias:   [out_features]               float32
    """
    B, in_f = x.shape
    out_f = weight.shape[0]
    b2d = bias.reshape(1, out_f)

    # --- batch-tile heuristic ---
    # * Tiles must be a multiple of 8 (sublane constraint).
    # * Prefer the biggest tile that fits: the kernel is step-overhead bound, not
    #   bandwidth bound (each row is only 40 B in / 40 B out).
    # * v7x only: ensure >= min_grid_steps grid steps (both TCs engage) but only when
    #   the split keeps tiles >= 1024 rows, so v5e/v6e never pay extra step overhead.
    padded_min = max(8, ((B + 7) // 8) * 8)
    tb = min(max_tile_rows, padded_min)
    if min_grid_steps > 1 and padded_min >= min_grid_steps * 1024:
        per_step = -(-padded_min // min_grid_steps)          # ceil div
        tb = min(tb, ((per_step + 7) // 8) * 8)
    tb = max(8, (tb // 8) * 8)

    padded_b = ((B + tb - 1) // tb) * tb
    if padded_b != B:
        x = jnp.pad(x, ((0, padded_b - B), (0, 0)))

    cost = pl.CostEstimate(
        flops=2 * B * in_f * out_f,
        transcendentals=0,
        bytes_accessed=4 * (B * in_f + B * out_f + out_f * in_f + out_f),
    )

    y = pl.pallas_call(
        linear_kernel,
        out_shape=jax.ShapeDtypeStruct((padded_b, out_f), x.dtype),
        grid=(padded_b // tb,),
        in_specs=[
            pl.BlockSpec((tb, in_f), lambda i: (i, 0)),       # batch-tiled activations
            pl.BlockSpec((out_f, in_f), lambda i: (0, 0)),    # resident weight block
            pl.BlockSpec((1, out_f), lambda i: (0, 0)),       # resident bias block
        ],
        out_specs=pl.BlockSpec((tb, out_f), lambda i: (i, 0)),
        compiler_params=pltpu.CompilerParams(
            dimension_semantics=("parallel",),                # 2x on v7x's two TCs
            vmem_limit_bytes=vmem_limit_bytes,                # headroom for big tiles on v5e
        ),
        cost_estimate=cost,
    )(x, weight, b2d)

    return y[:B] if padded_b != B else y


if __name__ == "__main__":
    key = jax.random.PRNGKey(0)
    k_x, k_w, k_b, k_x2 = jax.random.split(key, 4)

    in_features, out_features = 10, 10

    # Deterministic parameter init mimicking PyTorch Linear's U(-1/sqrt(fan_in), 1/sqrt(fan_in)).
    bound = 1.0 / jnp.sqrt(jnp.float32(in_features))
    weight = jax.random.uniform(
        k_w, (out_features, in_features), jnp.float32, minval=-bound, maxval=bound
    )
    bias = jax.random.uniform(
        k_b, (out_features,), jnp.float32, minval=-bound, maxval=bound
    )

    # Primary small-batch check (single grid step).
    x_small = jax.random.normal(k_x, (8, in_features), jnp.float32)
    y_small = smallnet_forward(x_small, weight, bias)
    jax.block_until_ready(y_small)
    y_small_ref = x_small @ weight.T + bias
    assert y_small.shape == (8, out_features)
    assert jnp.allclose(y_small, y_small_ref, atol=1e-5, rtol=1e-5)

    # Coverage for the padded, multi-step-grid path (per review): B not a multiple of
    # 8 and larger than one tile -> grid >= 2 steps + zero-pad rows sliced off.
    x_big = jax.random.normal(k_x2, (2601, in_features), jnp.float32)
    y_big = smallnet_forward(x_big, weight, bias)
    jax.block_until_ready(y_big)
    y_big_ref = x_big @ weight.T + bias
    assert y_big.shape == (2601, out_features)
    assert jnp.allclose(y_big, y_big_ref, atol=1e-4, rtol=1e-4)

    print("KERNEL_OK")
</pallas_src>

<mosaic_0001>
module attributes {stable_mosaic.version = 11 : i64} {
  func.func @linear_kernel(%arg0: i32, %arg1: memref<8x10xf32, #tpu.memory_space<vmem>>, %arg2: memref<10x10xf32, #tpu.memory_space<vmem>>, %arg3: memref<1x10xf32, #tpu.memory_space<vmem>>, %arg4: memref<8x10xf32, #tpu.memory_space<vmem>>) attributes {dimension_semantics = [#tpu.dimension_semantics<parallel>], iteration_bounds = array<i64: 1>, scalar_prefetch = 0 : i64, scratch_operands = 0 : i64, tpu.core_type = #tpu.core_type<tc>, window_params = [{transform_indices = @transform_0, window_bounds = array<i64: 8, 10>}, {pipeline_mode = #tpu.pipeline_mode<synchronous>, transform_indices = @transform_1, window_bounds = array<i64: 10, 10>}, {pipeline_mode = #tpu.pipeline_mode<synchronous>, transform_indices = @transform_2, window_bounds = array<i64: 1, 10>}, {transform_indices = @transform_3, window_bounds = array<i64: 8, 10>}]} {
    %c0 = arith.constant 0 : index
    %c0_0 = arith.constant 0 : index
    %0 = vector.load %arg1[%c0, %c0_0] : memref<8x10xf32, #tpu.memory_space<vmem>>, vector<8x10xf32>
    %c0_1 = arith.constant 0 : index
    %c0_2 = arith.constant 0 : index
    %1 = vector.load %arg2[%c0_1, %c0_2] : memref<10x10xf32, #tpu.memory_space<vmem>>, vector<10x10xf32>
    %cst = arith.constant dense<0.000000e+00> : vector<8x10xf32>
    %2 = tpu.matmul %0, %1, %cst {dimension_numbers = #tpu.dot_dimension_numbers<[1], [1], [0], [0], [0, 0, 1, 0], [], []>} : vector<8x10xf32>, vector<10x10xf32>, vector<8x10xf32> -> vector<8x10xf32>
    %c0_3 = arith.constant 0 : index
    %c0_4 = arith.constant 0 : index
    %3 = vector.load %arg3[%c0_3, %c0_4] : memref<1x10xf32, #tpu.memory_space<vmem>>, vector<1x10xf32>
    %4 = vector.broadcast %3 : vector<1x10xf32> to vector<8x10xf32>
    %5 = arith.addf %2, %4 : vector<8x10xf32>
    %c0_5 = arith.constant 0 : index
    %c0_6 = arith.constant 0 : index
    %6 = vector.load %arg4[%c0_5, %c0_6] : memref<8x10xf32, #tpu.memory_space<vmem>>, vector<8x10xf32>
    tpu.vector_store %arg4[%c0_5, %c0_6], %5 {strides = array<i32>} : memref<8x10xf32, #tpu.memory_space<vmem>>, vector<8x10xf32>,
    return
  }
  func.func @transform_0(%arg0: i32) -> (i32, i32) {
    %c0_i32 = arith.constant 0 : i32
    %c0_i32_0 = arith.constant 0 : i32
    return %arg0, %c0_i32 : i32, i32
  }
  func.func @transform_1(%arg0: i32) -> (i32, i32) {
    %c0_i32 = arith.constant 0 : i32
    %c0_i32_0 = arith.constant 0 : i32
    %c0_i32_1 = arith.constant 0 : i32
    return %c0_i32, %c0_i32_0 : i32, i32
  }
  func.func @transform_2(%arg0: i32) -> (i32, i32) {
    %c0_i32 = arith.constant 0 : i32
    %c0_i32_0 = arith.constant 0 : i32
    %c0_i32_1 = arith.constant 0 : i32
    return %c0_i32, %c0_i32_0 : i32, i32
  }
  func.func @transform_3(%arg0: i32) -> (i32, i32) {
    %c0_i32 = arith.constant 0 : i32
    %c0_i32_0 = arith.constant 0 : i32
    return %arg0, %c0_i32 : i32, i32
  }
}

</mosaic_0001>

<bundles_post_ra>
// kernel: tpu_custom_call.1
= control target key start
LH: loop header
LB: loop body
LE: loop exit
PB: predicated region body
PF: predicated region fallthrough
CT: control target
= control target key end

     0   :  { %8 = vsyncpa [#allocation3], 0  ;;  %s320_s0 = inlined_call_operand.hbm [shape: f32[8,10], index: 0, kind: input, shape index: {}]   ;;  %s321_s1 = inlined_call_operand.hbm [shape: f32[10,10], index: 1, kind: input, shape index: {}]   ;;  %s322_s2 = inlined_call_operand.vmem [shape: f32[1,10], index: 2, kind: input, shape index: {}]   ;;  %s323_s3 = inlined_call_operand.hbm [shape: f32[8,10], index: 3, kind: output, shape index: {}]  }
   0x1   :  { %9 = vsyncpa [#allocation6], 0 }
   0x2   :  { %10 = vsyncpa [#allocation4], 0  ;;  %s246_s12 = smov [#allocation2]   ;;  %s247_s14 = smov [#allocation5]  }
   0x3   :  { %s17_s13 = sshll.u32 %s246_s12, 4  ;;  %s26_s15 = sshll.u32 %s247_s14, 4  ;;  %s18_s13 = int_to_ptr.vmem [resolvable:$true] %s17_s13  ;;  %s274_s15 = int_to_ptr.vmem [resolvable:$true] %s26_s15 }
   0x4   :  { %s174_s18 = scalar_lea.hbm %s320_s0, 128 }
   0x5   :  { %p175_p0 = scmp.ne.s32.totalorder %s320_s0, %s174_s18  ;;  %p178_p1 = scmp.lt.u32.totalorder %s174_s18, %s320_s0 }
   0x7   :  { %p180_p2 = pnand %p178_p1, %p175_p0 }
   0x9   :  { %183 = shalt.err (!%p180_p2)
}
   0xa   :  { %s184_s23 = scalar_lea.vmem %s18_s13, 128  ;;  %p189_p4 = scmp.lt.s32.totalorder %s18_s13, %s18_s13 }
   0xb   :  { %p185_p3 = scmp.ne.s32.totalorder %s18_s13, %s184_s23  ;;  %p190_p5 = scmp.lt.s32.totalorder %s184_s23, %s184_s23 }
   0xd   :  { %p191_p6 = por %p190_p5, %p189_p4 }
   0xf   :  { %p192_p7 = pnand %p191_p6, %p185_p3 }
  0x11   :  { %195 = shalt.err (!%p192_p7)
}
  0x12   :  { %20 = dma.hbm_to_vmem [thread:$0]  %s320_s0, 128, %s18_s13, [#allocation3]  }
  0x13   :  { %s196_s28 = scalar_lea.hbm %s321_s1, 256 }
  0x14   :  { %p197_p8 = scmp.ne.s32.totalorder %s321_s1, %s196_s28  ;;  %p200_p9 = scmp.lt.u32.totalorder %s196_s28, %s321_s1 }
  0x16   :  { %p202_p10 = pnand %p200_p9, %p197_p8 }
  0x18   :  { %205 = shalt.err (!%p202_p10)
}
  0x19   :  { %s206_s6 = scalar_lea.vmem %s274_s15, 256  ;;  %p211_p12 = scmp.lt.s32.totalorder %s274_s15, %s274_s15 }
  0x1a   :  { %p207_p11 = scmp.ne.s32.totalorder %s274_s15, %s206_s6  ;;  %p212_p13 = scmp.lt.s32.totalorder %s206_s6, %s206_s6 }
  0x1c   :  { %p213_p0 = por %p212_p13, %p211_p12 }
  0x1e   :  { %p214_p1 = pnand %p213_p0, %p207_p11 }
  0x20   :  { %217 = shalt.err (!%p214_p1)
}
  0x21   :  { %s248_s0 = smov 128   ;;  %s249_s7 = smov 8  }
  0x22   :  { %32 = dma.hbm_to_vmem [thread:$0]  %s321_s1, 256, %s274_s15, [#allocation6], %s248_s0, %s248_s0, %s249_s7  }
  0x23   :  { %240 = dma.done.wait [#allocation3], 128  }
  0x24   :  { %241 = vsyncadd [#allocation3], 4294967168 }
  0x25   :  { %242 = dma.done.wait [#allocation6], 256  }
  0x26   :  { %243 = vsyncadd [#allocation6], 4294967040  ;;  %v250_v0 = vmov 0.0|0.0   ;;  %vm251_vm0 = vmmov 0   ;;  %v252_v1 = vmov 0.0   ;;  %vm51_vm1 = vcmask 80896  }
  0x27   :  { %162 = vmatprep.subr.bf16.mxu0 %v250_v0  ;;  %159 = vmatprep.mubr.msk.f32.mxu0 %vm251_vm0, %v252_v1  ;;  %v42_v2 = vld [vmem:[#allocation5] sm:$0xff]  ;;  %v43_v3 = vld [vmem:[#allocation5 + $0x8] sm:$0x3]  ;;  %vm164_vm2 = vmpackc.low %vm51_vm1, %vm51_vm1  ;;  %s253_s1 = smov [#allocation7]  }
  0x28   :  { %v163_v4 = vpack.c.bf16 %v43_v3, %v42_v2  ;;  %v41_v5 = vld [vmem:[#allocation2] sm:$0xff]  ;;  %s138_s12 = sshll.u32 %s253_s1, 4  ;;  %s139_s12 = int_to_ptr.vmem [resolvable:$true] %s138_s12 }
  0x29   :  { %v148_v6 = vld [vmem:[%s322_s2] ss:$0 sm:$0xff]  ;;  %s218_s13 = scalar_lea.vmem %s139_s12, 128  ;;  %p223_p3 = scmp.lt.s32.totalorder %s139_s12, %s139_s12 }
  0x2a   :  { %165 = vmatpush3.bf16.xpose.msk.msra.mxu0 %vm164_vm2, %v163_v4  ;;  %p219_p2 = scmp.ne.s32.totalorder %s139_s12, %s218_s13  ;;  %p224_p4 = scmp.lt.s32.totalorder %s218_s13, %s218_s13 }
  0x2c   :  { %p225_p5 = por %p224_p4, %p223_p3 }
  0x2e   :  { %p226_p6 = pnand %p225_p5, %p219_p2 }
  0x31   :  { %160 = vmatmul.mubr.msk.f32.vlgmr.msra.gmra.mrb[0].mxu0 %vm51_vm1, %v41_v5 }
 0x104   :  { %v127_v7 = vpop.f32.mrb[0].mxu0 }
 0x105   :  { %v128_v8 = vadd.f32 %v148_v6, %v127_v7  ;;  %v161_v9 = vpop.f32.mrb[1].mxu0 }
 0x107   :  { %131 = vst.msk [vmem:[#allocation7] sm:$0xff] %vm51_vm1, %v128_v8 }
 0x108   :  { %229 = shalt.err (!%p226_p6)
}
 0x109   :  { %s230_s16 = scalar_lea.hbm %s323_s3, 128 }
 0x10a   :  { %p231_p7 = scmp.ne.s32.totalorder %s323_s3, %s230_s16  ;;  %p234_p8 = scmp.lt.u32.totalorder %s230_s16, %s323_s3 }
 0x10c   :  { %p236_p9 = pnand %p234_p8, %p231_p7 }
 0x10e   :  { %239 = shalt.err (!%p236_p9)
}
 0x10f   :  { %141 = dma.vmem_to_hbm [thread:$0]  %s139_s12, 128, %s323_s3, [#allocation4]  }
 0x110   :  { %244 = dma.done.wait [#allocation4], 128  }
 0x111   :  { %245 = vsyncadd [#allocation4], 4294967168 }
 0x112   :  { %145 = vsyncpa [#allocation3], 1 }
 0x113   :  { %146 = vsyncpa [#allocation6], 1 }
 0x114   :  { %147 = vsyncpa [#allocation4], 1 }

</bundles_post_ra>
